<compile_context>
chip_gen: v7x
topology: tpu7x:2x2x1
jax: 0.10.0
libtpu: 0.0.40
codegen_flags: <defaults>
</compile_context>

<pallas_src>
import jax
import jax.numpy as jnp
from jax.experimental import pallas as pl
from jax.experimental.pallas import tpu as pltpu

EPS = 1e-5  # PyTorch nn.LayerNorm default eps


def _norm(x):
    # LayerNorm WITHOUT affine (gamma/beta folded into the following matmul).
    mu = jnp.mean(x, axis=-1, keepdims=True)
    var = jnp.mean(jnp.square(x - mu), axis=-1, keepdims=True)
    return (x - mu) * jax.lax.rsqrt(var + EPS)


def _gelu_exact(x):
    # PyTorch nn.GELU() default: exact erf formulation.
    return 0.5 * x * (1.0 + jax.lax.erf(x * 0.7071067811865476))


def _bspec(shape, index_map, *, single=False):
    """BlockSpec helper; single=True requests single-buffering (constant index)."""
    if single and hasattr(pl, "Buffered"):
        try:
            return pl.BlockSpec(shape, index_map, pipeline_mode=pl.Buffered(1))
        except TypeError:  # older jax without pipeline_mode kwarg
            pass
    return pl.BlockSpec(shape, index_map)


# --------- kernel 0: norm1_2(x_t) + fused k|v projection (once per batch) ----------
def _kv_kernel(xt_ref, wkv_ref, bkv_ref, k_ref, v_ref):
    dt = wkv_ref.dtype
    C = k_ref.shape[-1]
    xtn = _norm(xt_ref[0]).astype(dt)                       # (tm, C)
    kv = jnp.dot(xtn, wkv_ref[...],
                 preferred_element_type=jnp.float32) + bkv_ref[...]  # (tm, 2C) f32
    k_ref[0] = kv[:, :C].astype(k_ref.dtype)
    v_ref[0] = kv[:, C:].astype(v_ref.dtype)


# --------- kernel 1: norm1_1(x_i) + q + softmax + transposed PV matmul -------------
def _attn_kernel(xi_ref, k_ref, v_ref, wq_ref, bq_ref, yt_ref):
    dt = wq_ref.dtype
    approx = bool(dt != jnp.float32)        # exact reciprocal on f32 validation path

    xin = _norm(xi_ref[0]).astype(dt)                       # (tn, C)
    q = (jnp.dot(xin, wq_ref[...],
                 preferred_element_type=jnp.float32) + bq_ref[...]).astype(dt)
    k = k_ref[0]                                            # (M, C) mxu dtype
    v = v_ref[0]                                            # (M, C) mxu dtype

    # scores = q @ k^T  (attn scale already folded into q's weights)
    s = jax.lax.dot_general(q, k, (((1,), (1,)), ((), ())),
                            preferred_element_type=jnp.float32)       # (tn, M)
    s = s - jnp.max(s, axis=-1, keepdims=True)
    p = jnp.exp(s)
    p = p * pl.reciprocal(jnp.sum(p, axis=-1, keepdims=True), approx=approx)

    # torch: (attn @ v).transpose(1, 2)  ->  computed directly on the MXU as
    # v^T-contraction: (C, tn).  The (B,C,N)->(B,N,C) reshape in the wrapper is
    # a contiguous row-major reshape (bug-compatible torch scramble).
    yt = jax.lax.dot_general(v, p.astype(dt), (((0,), (1,)), ((), ())),
                             preferred_element_type=jnp.float32)      # (C, tn)
    yt_ref[0] = yt.astype(yt_ref.dtype)


# --------- kernel 2: proj + residual + norm2 + MLP + residual -----------------------
def _ffn_kernel(xi_ref, ys_ref, wp_ref, bp_ref, w1_ref, b1_ref,
                w2_ref, b2_ref, out_ref):
    dt = wp_ref.dtype
    xi = xi_ref[0]                          # (tn, C) original x_i rows, f32
    ys = ys_ref[0].astype(dt)               # (tn, C) scrambled attention output

    proj = jnp.dot(ys, wp_ref[...], preferred_element_type=jnp.float32) + bp_ref[...]
    x = xi + proj                           # first residual (f32)

    h = _norm(x).astype(dt)                 # norm2 affine folded into w1/b1
    h1 = jnp.dot(h, w1_ref[...], preferred_element_type=jnp.float32) + b1_ref[...]
    h1 = _gelu_exact(h1).astype(dt)
    m = jnp.dot(h1, w2_ref[...], preferred_element_type=jnp.float32) + b2_ref[...]

    out_ref[0] = (x + m).astype(out_ref.dtype)   # second residual


def block_forward(x_i, x_t, params, num_heads, *,
                  mxu_dtype=jnp.bfloat16, tile_n=128, tile_m=128,
                  vmem_limit_bytes=48 * 1024 * 1024):
    """Pallas implementation of Block.forward (dropout / drop_path are identity).

    Tuning notes: v6e can use tile_n=256 / vmem_limit ~96 MiB; v7x should keep
    tile_n=128 and vmem_limit <= ~56 MiB (64 MiB physical VMEM).
    """
    B, N, C = x_i.shape
    _, M, _ = x_t.shape
    H = params["w1"].shape[0]
    scale = float((C // num_heads) ** -0.5)
    f32 = jnp.float32

    # ---- wrapper-side algebra: fold LayerNorm affine (+ attn scale) into weights ---
    g11, b11 = params["g11"].astype(f32), params["b11"].astype(f32)
    g12, b12 = params["g12"].astype(f32), params["b12"].astype(f32)
    g2, b2 = params["g2"].astype(f32), params["b2"].astype(f32)
    wqT = params["wq"].T.astype(f32)
    wkT = params["wk"].T.astype(f32)
    wvT = params["wv"].T.astype(f32)
    wpT = params["wp"].T.astype(f32)
    w1T = params["w1"].T.astype(f32)
    w2T = params["w2"].T.astype(f32)

    wq_f = ((scale * g11)[:, None] * wqT).astype(mxu_dtype)
    bq_f = (scale * (b11 @ wqT)).reshape(1, C)
    # fused k|v projection: one (C, 2C) weight, one MXU matmul per x_t tile
    wkv_f = jnp.concatenate([g12[:, None] * wkT, g12[:, None] * wvT],
                            axis=1).astype(mxu_dtype)                  # (C, 2C)
    bkv_f = jnp.concatenate([b12 @ wkT, b12 @ wvT]).reshape(1, 2 * C)  # (1, 2C)
    wp_f = wpT.astype(mxu_dtype)
    bp_f = params["bp"].astype(f32).reshape(1, C)
    w1_f = (g2[:, None] * w1T).astype(mxu_dtype)
    b1_f = (b2 @ w1T + params["bm1"].astype(f32)).reshape(1, H)
    w2_f = w2T.astype(mxu_dtype)
    b2_f = params["bm2"].astype(f32).reshape(1, C)

    tn = tile_n if (tile_n <= N and N % tile_n == 0) else N
    tm = tile_m if (tile_m <= M and M % tile_m == 0) else M

    cp = pltpu.CompilerParams(
        dimension_semantics=("parallel", "parallel"),
        vmem_limit_bytes=vmem_limit_bytes,
    )

    # ---- kernel 0: k/v precompute (once per batch / M-tile, never per N-tile) ------
    k_all, v_all = pl.pallas_call(
        _kv_kernel,
        out_shape=(jax.ShapeDtypeStruct((B, M, C), mxu_dtype),
                   jax.ShapeDtypeStruct((B, M, C), mxu_dtype)),
        grid=(B, M // tm),
        in_specs=[
            _bspec((1, tm, C), lambda b, m: (b, m, 0)),
            _bspec((C, 2 * C), lambda b, m: (0, 0), single=True),
            _bspec((1, 2 * C), lambda b, m: (0, 0), single=True),
        ],
        out_specs=(_bspec((1, tm, C), lambda b, m: (b, m, 0)),
                   _bspec((1, tm, C), lambda b, m: (b, m, 0))),
        compiler_params=cp,
    )(x_t, wkv_f, bkv_f)

    # ---- kernel 1: attention core, TRANSPOSED output (B, C, N) ---------------------
    yt = pl.pallas_call(
        _attn_kernel,
        out_shape=jax.ShapeDtypeStruct((B, C, N), mxu_dtype),
        grid=(B, N // tn),
        in_specs=[
            _bspec((1, tn, C), lambda b, n: (b, n, 0)),                 # x_i rows
            _bspec((1, M, C), lambda b, n: (b, 0, 0), single=True),     # k (per batch)
            _bspec((1, M, C), lambda b, n: (b, 0, 0), single=True),     # v (per batch)
            _bspec((C, C), lambda b, n: (0, 0), single=True),           # wq'
            _bspec((1, C), lambda b, n: (0, 0), single=True),           # bq'
        ],
        out_specs=_bspec((1, C, tn), lambda b, n: (b, 0, n)),
        compiler_params=cp,
    )(x_i, k_all, v_all, wq_f, bq_f)

    # torch `.transpose(1,2).reshape(B,N,C)`: transpose already done on the MXU;
    # this reshape is contiguous/row-major (cheap metadata-level op).
    y_s = yt.reshape(B, N, C)

    # ---- kernel 2: proj + residual + norm2 + MLP + residual ------------------------
    out = pl.pallas_call(
        _ffn_kernel,
        out_shape=jax.ShapeDtypeStruct((B, N, C), x_i.dtype),
        grid=(B, N // tn),
        in_specs=[
            _bspec((1, tn, C), lambda b, n: (b, n, 0)),                 # x_i rows
            _bspec((1, tn, C), lambda b, n: (b, n, 0)),                 # scrambled attn
            _bspec((C, C), lambda b, n: (0, 0), single=True),           # wp
            _bspec((1, C), lambda b, n: (0, 0), single=True),           # bp
            _bspec((C, H), lambda b, n: (0, 0), single=True),           # w1'
            _bspec((1, H), lambda b, n: (0, 0), single=True),           # b1'
            _bspec((H, C), lambda b, n: (0, 0), single=True),           # w2
            _bspec((1, C), lambda b, n: (0, 0), single=True),           # b2
        ],
        out_specs=_bspec((1, tn, C), lambda b, n: (b, n, 0)),
        compiler_params=cp,
    )(x_i, y_s, wp_f, bp_f, w1_f, b1_f, w2_f, b2_f)

    return out


# ----------------------------- pure-JAX reference (f32) -----------------------------
def block_reference(x_i, x_t, p, num_heads):
    B, N, C = x_i.shape
    scale = (C // num_heads) ** -0.5

    def ln(x, g, b):
        mu = x.mean(-1, keepdims=True)
        var = ((x - mu) ** 2).mean(-1, keepdims=True)
        return (x - mu) / jnp.sqrt(var + EPS) * g + b

    xin = ln(x_i, p["g11"], p["b11"])
    xtn = ln(x_t, p["g12"], p["b12"])
    q = xin @ p["wq"].T
    k = xtn @ p["wk"].T
    v = xtn @ p["wv"].T
    attn = jax.nn.softmax(jnp.einsum("bnc,bmc->bnm", q, k) * scale, axis=-1)
    y = attn @ v
    y = jnp.transpose(y, (0, 2, 1)).reshape(B, N, C)     # torch transpose+reshape bug
    y = y @ p["wp"].T + p["bp"]
    x = x_i + y
    h = ln(x, p["g2"], p["b2"])
    h1 = h @ p["w1"].T + p["bm1"]
    h1 = _gelu_exact(h1)
    m = h1 @ p["w2"].T + p["bm2"]
    return x + m


def init_params(key, dim, mlp_ratio=4.0):
    H = int(dim * mlp_ratio)
    ks = jax.random.split(key, 12)
    n = lambda k, s, sc=0.02: sc * jax.random.normal(k, s, dtype=jnp.float32)
    return {
        "g11": 1.0 + n(ks[0], (dim,), 0.1), "b11": n(ks[1], (dim,), 0.1),
        "g12": 1.0 + n(ks[2], (dim,), 0.1), "b12": n(ks[3], (dim,), 0.1),
        "wq": n(ks[4], (dim, dim)), "wk": n(ks[5], (dim, dim)),
        "wv": n(ks[6], (dim, dim)),
        "wp": n(ks[7], (dim, dim)), "bp": n(ks[8], (dim,), 0.1),
        "g2": 1.0 + n(ks[9], (dim,), 0.1), "b2": n(ks[10], (dim,), 0.1),
        "w1": n(ks[11], (H, dim)), "bm1": jnp.zeros((H,), jnp.float32),
        "w2": n(jax.random.fold_in(key, 99), (dim, H)),
        "bm2": jnp.zeros((dim,), jnp.float32),
    }


if __name__ == "__main__":
    on_tpu = jax.devices()[0].platform == "tpu"

    def run_case(B, N, M, C, num_heads, tile_n, key):
        k_xi, k_xt, k_p = jax.random.split(key, 3)
        x_i = jax.random.normal(k_xi, (B, N, C), dtype=jnp.float32)
        x_t = jax.random.normal(k_xt, (B, M, C), dtype=jnp.float32)
        params = init_params(k_p, C)
        ref = block_reference(x_i, x_t, params, num_heads)

        # f32-MXU path: runs on any backend (tight tolerance, exact reciprocal).
        out_f32 = jax.block_until_ready(
            block_forward(x_i, x_t, params, num_heads,
                          mxu_dtype=jnp.float32, tile_n=tile_n))
        assert out_f32.shape == (B, N, C)
        assert jnp.allclose(out_f32, ref, atol=2e-3, rtol=2e-3), "f32 path mismatch"

        # bf16-MXU fast path: only on a real TPU (CPU backends cannot execute
        # BF16xBF16=F32 dots).
        if on_tpu:
            out_bf16 = jax.block_until_ready(
                block_forward(x_i, x_t, params, num_heads,
                              mxu_dtype=jnp.bfloat16, tile_n=tile_n))
            assert out_bf16.shape == (B, N, C)
            assert jnp.allclose(out_bf16, ref, atol=3e-2, rtol=3e-2), \
                "bf16 path mismatch"

    key = jax.random.PRNGKey(0)
    # Small shapes implied by the module (single tile per batch).
    run_case(B=2, N=8, M=16, C=32, num_heads=4, tile_n=128, key=key)
    # Lane/sublane-aligned multi-tile shapes exercising the real tiled path.
    run_case(B=2, N=256, M=64, C=128, num_heads=4, tile_n=128,
             key=jax.random.fold_in(key, 1))

    print("KERNEL_OK")
</pallas_src>

<mosaic_0001>
module attributes {stable_mosaic.version = 11 : i64} {
  func.func @_kv_kernel(%arg0: i32, %arg1: i32, %arg2: memref<1x16x32xf32, #tpu.memory_space<vmem>>, %arg3: memref<32x64xf32, #tpu.memory_space<vmem>>, %arg4: memref<1x64xf32, #tpu.memory_space<vmem>>, %arg5: memref<1x16x32xf32, #tpu.memory_space<vmem>>, %arg6: memref<1x16x32xf32, #tpu.memory_space<vmem>>) attributes {dimension_semantics = [#tpu.dimension_semantics<parallel>, #tpu.dimension_semantics<parallel>], iteration_bounds = array<i64: 2, 1>, scalar_prefetch = 0 : i64, scratch_operands = 0 : i64, tpu.core_type = #tpu.core_type<tc>, window_params = [{transform_indices = @transform_0, window_bounds = array<i64: 1, 16, 32>}, {pipeline_mode = #tpu.pipeline_mode<synchronous>, transform_indices = @transform_1, window_bounds = array<i64: 32, 64>}, {pipeline_mode = #tpu.pipeline_mode<synchronous>, transform_indices = @transform_2, window_bounds = array<i64: 1, 64>}, {transform_indices = @transform_3, window_bounds = array<i64: 1, 16, 32>}, {transform_indices = @transform_4, window_bounds = array<i64: 1, 16, 32>}]} {
    %c0 = arith.constant 0 : index
    %c0_0 = arith.constant 0 : index
    %c0_1 = arith.constant 0 : index
    %0 = vector.load %arg2[%c0, %c0_0, %c0_1] : memref<1x16x32xf32, #tpu.memory_space<vmem>>, vector<1x16x32xf32>
    %1 = vector.shape_cast %0 : vector<1x16x32xf32> to vector<16x32xf32>
    %cst = arith.constant dense<0.000000e+00> : vector<16xf32>
    %2 = vector.multi_reduction <add>, %1, %cst [1] : vector<16x32xf32> to vector<16xf32>
    %3 = vector.shape_cast %2 : vector<16xf32> to vector<16x1xf32>
    %cst_2 = arith.constant 3.200000e+01 : f32
    %4 = vector.broadcast %cst_2 : f32 to vector<16x1xf32>
    %5 = arith.divf %3, %4 : vector<16x1xf32>
    %6 = vector.broadcast %5 : vector<16x1xf32> to vector<16x32xf32>
    %7 = arith.subf %1, %6 : vector<16x32xf32>
    %8 = arith.mulf %7, %7 : vector<16x32xf32>
    %cst_3 = arith.constant dense<0.000000e+00> : vector<16xf32>
    %9 = vector.multi_reduction <add>, %8, %cst_3 [1] : vector<16x32xf32> to vector<16xf32>
    %10 = vector.shape_cast %9 : vector<16xf32> to vector<16x1xf32>
    %cst_4 = arith.constant 3.200000e+01 : f32
    %11 = vector.broadcast %cst_4 : f32 to vector<16x1xf32>
    %12 = arith.divf %10, %11 : vector<16x1xf32>
    %13 = vector.broadcast %5 : vector<16x1xf32> to vector<16x32xf32>
    %14 = arith.subf %1, %13 : vector<16x32xf32>
    %cst_5 = arith.constant 9.99999974E-6 : f32
    %15 = vector.broadcast %cst_5 : f32 to vector<16x1xf32>
    %16 = arith.addf %12, %15 : vector<16x1xf32>
    %17 = math.rsqrt %16 : vector<16x1xf32>
    %18 = vector.broadcast %17 : vector<16x1xf32> to vector<16x32xf32>
    %19 = arith.mulf %14, %18 : vector<16x32xf32>
    %c0_6 = arith.constant 0 : index
    %c0_7 = arith.constant 0 : index
    %20 = vector.load %arg3[%c0_6, %c0_7] : memref<32x64xf32, #tpu.memory_space<vmem>>, vector<32x64xf32>
    %cst_8 = arith.constant dense<0.000000e+00> : vector<16x64xf32>
    %21 = tpu.matmul %19, %20, %cst_8 {dimension_numbers = #tpu.dot_dimension_numbers<[1], [0], [0], [1], [0, 0, 1, 1], [], []>} : vector<16x32xf32>, vector<32x64xf32>, vector<16x64xf32> -> vector<16x64xf32>
    %c0_9 = arith.constant 0 : index
    %c0_10 = arith.constant 0 : index
    %22 = vector.load %arg4[%c0_9, %c0_10] : memref<1x64xf32, #tpu.memory_space<vmem>>, vector<1x64xf32>
    %23 = vector.broadcast %22 : vector<1x64xf32> to vector<16x64xf32>
    %24 = arith.addf %21, %23 : vector<16x64xf32>
    %25 = vector.extract_strided_slice %24 {offsets = [0, 0], sizes = [16, 32], strides = [1, 1]} : vector<16x64xf32> to vector<16x32xf32>
    %c0_11 = arith.constant 0 : index
    %c0_12 = arith.constant 0 : index
    %c0_13 = arith.constant 0 : index
    %26 = vector.load %arg5[%c0_11, %c0_12, %c0_13] : memref<1x16x32xf32, #tpu.memory_space<vmem>>, vector<1x16x32xf32>
    %27 = vector.shape_cast %26 : vector<1x16x32xf32> to vector<16x32xf32>
    %28 = vector.shape_cast %25 : vector<16x32xf32> to vector<1x16x32xf32>
    tpu.vector_store %arg5[%c0_11, %c0_12, %c0_13], %28 {strides = array<i32>} : memref<1x16x32xf32, #tpu.memory_space<vmem>>, vector<1x16x32xf32>,
    %29 = vector.extract_strided_slice %24 {offsets = [0, 32], sizes = [16, 32], strides = [1, 1]} : vector<16x64xf32> to vector<16x32xf32>
    %c0_14 = arith.constant 0 : index
    %c0_15 = arith.constant 0 : index
    %c0_16 = arith.constant 0 : index
    %30 = vector.load %arg6[%c0_14, %c0_15, %c0_16] : memref<1x16x32xf32, #tpu.memory_space<vmem>>, vector<1x16x32xf32>
    %31 = vector.shape_cast %30 : vector<1x16x32xf32> to vector<16x32xf32>
    %32 = vector.shape_cast %29 : vector<16x32xf32> to vector<1x16x32xf32>
    tpu.vector_store %arg6[%c0_14, %c0_15, %c0_16], %32 {strides = array<i32>} : memref<1x16x32xf32, #tpu.memory_space<vmem>>, vector<1x16x32xf32>,
    return
  }
  func.func @transform_0(%arg0: i32, %arg1: i32) -> (i32, i32, i32) {
    %c0_i32 = arith.constant 0 : i32
    %c0_i32_0 = arith.constant 0 : i32
    return %arg0, %arg1, %c0_i32 : i32, i32, i32
  }
  func.func @transform_1(%arg0: i32, %arg1: i32) -> (i32, i32) {
    %c0_i32 = arith.constant 0 : i32
    %c0_i32_0 = arith.constant 0 : i32
    %c0_i32_1 = arith.constant 0 : i32
    return %c0_i32, %c0_i32_0 : i32, i32
  }
  func.func @transform_2(%arg0: i32, %arg1: i32) -> (i32, i32) {
    %c0_i32 = arith.constant 0 : i32
    %c0_i32_0 = arith.constant 0 : i32
    %c0_i32_1 = arith.constant 0 : i32
    return %c0_i32, %c0_i32_0 : i32, i32
  }
  func.func @transform_3(%arg0: i32, %arg1: i32) -> (i32, i32, i32) {
    %c0_i32 = arith.constant 0 : i32
    %c0_i32_0 = arith.constant 0 : i32
    return %arg0, %arg1, %c0_i32 : i32, i32, i32
  }
  func.func @transform_4(%arg0: i32, %arg1: i32) -> (i32, i32, i32) {
    %c0_i32 = arith.constant 0 : i32
    %c0_i32_0 = arith.constant 0 : i32
    return %arg0, %arg1, %c0_i32 : i32, i32, i32
  }
}

</mosaic_0001>

<bundles_post_ra>
// kernel: tpu_custom_call.1
= control target key start
LH: loop header
LB: loop body
LE: loop exit
PB: predicated region body
PF: predicated region fallthrough
CT: control target
= control target key end

     0   :  { %10 = vsyncpa [#allocation3], 0  ;;  %s1205_s0 = inlined_call_operand.hbm [shape: f32[2,16,32], index: 0, kind: input, shape index: {}]   ;;  %s1206_s1 = inlined_call_operand.hbm [shape: f32[32,64], index: 1, kind: input, shape index: {}]   ;;  %s1207_s2 = inlined_call_operand.vmem [shape: f32[1,64], index: 2, kind: input, shape index: {}]   ;;  %s1208_s3 = inlined_call_operand.hbm [shape: f32[2,16,32], index: 3, kind: output, shape index: {0}]   ;;  %s1209_s4 = inlined_call_operand.hbm [shape: f32[2,16,32], index: 4, kind: output, shape index: {1}]  }
   0x1   :  { %12 = vsyncpa [#allocation3 + $0x1], 0 }
   0x2   :  { %13 = vsyncpa [#allocation6], 0 }
   0x3   :  { %14 = vsyncpa [#allocation4], 0 }
   0x4   :  { %16 = vsyncpa [#allocation4 + $0x1], 0 }
   0x5   :  { %17 = vsyncpa [#allocation9], 0 }
   0x6   :  { %19 = vsyncpa [#allocation9 + $0x1], 0  ;;  %s921_s15 = smov 0   ;;  %s923_s16 = smov 0  }
   0x7   :  { %s925_s17 = smov 0   ;;  %s927_s18 = smov 0  }
   0x8   :  { %s929_s19 = smov 0   ;;  %s931_s20 = smov 0  }
   0x9 LB: > { %s570_s21 = sadd.s32 4294967295, %s885_s20   ;;  %s571_s22 = sadd.s32 4294967294, %s885_s20   ;;  %s885_s20 = sphi %s931_s20, %s25_s20   ;;  %s881_s19 = sphi %s929_s19, %s1233_s19   ;;  %s877_s18 = sphi %s927_s18, %s1232_s18   ;;  %s873_s17 = sphi %s925_s17, %s1231_s17   ;;  %s869_s16 = sphi %s923_s16, %s1230_s16   ;;  %s865_s15 = sphi %s921_s15, %s1229_s15  }
   0xa   : > { %p59_p0 = scmp.ne.s32.totalorder %s869_s16, %s865_s15  ;;  %p955_p1 = scmp.eq.s32.totalorder %s570_s21, 0 }
   0xb   : > { %p959_p2 = scmp.eq.s32.totalorder %s570_s21, 1  ;;  %p133_p3 = scmp.eq.s32.totalorder %s571_s22, 1 }
   0xc   : > { %s1214_s23 = scalar_select %p955_p1, 1, 0 }
   0xd   : > { %s1215_s24 = scalar_select %p959_p2, 1, 0 }
   0xe   : > { %p965_p4 = por %p955_p1, %p59_p0  ;;  %p572_p5 = scmp.ge.s32.totalorder %s885_s20, 1 }
   0xf   : > { %p970_p6 = por %p133_p3, %p59_p0  ;;  %p168_p7 = scmp.lt.s32.totalorder %s885_s20, 3 }
  0x10   : > { %s1216_s25 = scalar_select %p965_p4, 1, 0 }
  0x11   : > { %s1217_s26 = scalar_select %p970_p6, 1, 0 }
  0x12   : > { %p975_p8 = pnand %p572_p5, %p168_p7  ;;  %s887_s28 = smov [#allocation5]  }
  0x13   : > { %s180_s29 = sshll.u32 %s887_s28, 4  ;;  %s37_s5 = sadd.s32 1, %s881_s19  ;;  %s181_s29 = int_to_ptr.vmem [resolvable:$true] %s180_s29 }
  0x14   : > { %s1218_s27 = scalar_select %p975_p8, 1, 0 }
  0x15   : > { %p632_p9 = pneg %p975_p8  ;;  %s709_s8 = scalar_lea.hbm %s1206_s1, 512 }
  0x16   : > { %p710_p12 = scmp.ne.s32.totalorder %s1206_s1, %s709_s8  ;;  %p716_p5 = scmp.lt.u32.totalorder %s709_s8, %s1206_s1 }
  0x17   : > { %p984_p11 = pnand %p632_p9, %p955_p1 }
  0x19   : > { %p711_p13 = pneg %p984_p11 }
  0x1b   : > { %p712_p0 = pnand %p711_p13, %p710_p12 }
  0x1d   : > { %p713_p3 = pneg %p712_p0 }
  0x1f   : > { %p718_p7 = pnand %p716_p5, %p713_p3 }
  0x21   : > { %721 = shalt.err (!%p718_p7)
}
  0x22   : > { %s722_s13 = scalar_lea.vmem %s181_s29, 512  ;;  %p730_p1 = scmp.lt.s32.totalorder %s181_s29, %s181_s29 }
  0x23   : > { %p723_p9 = scmp.ne.s32.totalorder %s181_s29, %s722_s13  ;;  %p731_p4 = scmp.lt.s32.totalorder %s722_s13, %s722_s13 }
  0x25   : > { %p725_p10 = pnand %p723_p9, %p711_p13  ;;  %p732_p8 = por %p731_p4, %p730_p1 }
  0x27   : > { %p726_p6 = pneg %p725_p10 }
  0x29   : > { %p733_p2 = pnand %p732_p8, %p726_p6 }
  0x2b   : > { %736 = shalt.err (!%p733_p2)
}
  0x2c   : > { %s888_s14 = smov 128   ;;  %s889_s21 = smov 8  }
  0x2d   : > { %635 = dma.hbm_to_vmem [thread:$0]  (!%p984_p11), %s1206_s1, 512, %s181_s29, [#allocation6], %s888_s14, %s888_s14, %s889_s21  }
  0x2e   : > { %p39_p1 = scmp.ge.s32.totalorder %s37_s5, 2  ;;  %s46_s6 = sadd.s32 1, %s873_s17 }
  0x2f   : > { %p53_p2 = scmp.ne.s32.totalorder %s873_s17, %s869_s16  ;;  %p54_p4 = scmp.eq.s32.totalorder %s885_s20, 0 }
  0x30   : > { %s1235_s5 = smov (%p39_p1, %s37_s5), 0  ;;  %p1221_p8 = scmp.ne.s32.totalorder %s1215_s24, 0 }
  0x31   : > { %p1014_p6 = por %p54_p4, %p53_p2  ;;  %s41_s8 = ssub.s32 %s881_s19, %s1235_s5 }
  0x32   : > { %p1020_p10 = por %p1221_p8, %p53_p2  ;;  %p648_p12 = scmp.lt.s32.totalorder %s885_s20, 2 }
  0x33   : > { %p44_p11 = scmp.eq.s32.totalorder %s41_s8, 0  ;;  %s197_s29 = sand.u32 1, %s873_s17  }
  0x34   : > { %s575_s9 = sshll.u32 %s197_s29, 4  ;;  %s594_s11 = sshll.u32 %s881_s19, 8 }
  0x35   : > { %s1029_s10 = scalar_select %p44_p11, %s873_s17, %s46_s6  }
  0x36   : > { %s1035_s22 = scalar_lea.hbm %s1205_s0, %s594_s11  ;;  %s201_s24 = scalar_lea.vmem [#allocation2], %s575_s9 }
  0x37   : > { %s210_s28 = sshll.u32 %s201_s24, 4  ;;  %p1041_p13 = pnand %p648_p12, %p1014_p6  ;;  %s1037_s28 = int_to_ptr.vmem [resolvable:$true] %s210_s28 }
  0x38   : > { %s1045_s6 = scalar_lea.sflag [#allocation3], %s197_s29  ;;  %s737_s12 = scalar_lea.hbm %s1035_s22, 256 }
  0x39   : > { %p738_p0 = scmp.ne.s32.totalorder %s1035_s22, %s737_s12  ;;  %p739_p3 = pneg %p1041_p13 }
  0x3a   : > { %s742_s7 = scalar_lea.hbm %s1205_s0, 512  ;;  %p743_p9 = scmp.lt.u32.totalorder %s1035_s22, %s1205_s0 }
  0x3b   : > { %p740_p5 = pnand %p739_p3, %p738_p0  ;;  %p744_p1 = scmp.lt.u32.totalorder %s742_s7, %s737_s12 }
  0x3c   : > { %p746_p4 = scmp.lt.u32.totalorder %s737_s12, %s1035_s22 }
  0x3d   : > { %p741_p7 = pneg %p740_p5  ;;  %p745_p2 = por %p744_p1, %p743_p9 }
  0x3f   : > { %p747_p6 = por %p746_p4, %p745_p2 }
  0x41   : > { %p748_p8 = pnand %p747_p6, %p741_p7 }
  0x43   : > { %751 = shalt.err (!%p748_p8)
}
  0x44   : > { %s752_s29 = scalar_lea.vmem %s1037_s28, 256  ;;  %s890_s9 = smov [#allocation2]  }
  0x45   : > { %p753_p12 = scmp.ne.s32.totalorder %s1037_s28, %s752_s29  ;;  %s757_s11 = sshll.u32 %s890_s9, 4  ;;  %s758_s11 = int_to_ptr.vmem [resolvable:$false] %s757_s11 }
  0x46   : > { %s759_s13 = scalar_lea.vmem %s758_s11, 512  ;;  %p760_p5 = scmp.lt.s32.totalorder %s1037_s28, %s758_s11 }
  0x47   : > { %p755_p11 = pnand %p753_p12, %p739_p3  ;;  %p761_p9 = scmp.lt.s32.totalorder %s759_s13, %s752_s29 }
  0x49   : > { %p756_p0 = pneg %p755_p11  ;;  %p762_p1 = por %p761_p9, %p760_p5 }
  0x4b   : > { %p763_p2 = pnand %p762_p1, %p756_p0 }
  0x4d   : > { %766 = shalt.err (!%p763_p2)
}
  0x4e   : > { %639 = dma.hbm_to_vmem [thread:$0]  (!%p1041_p13), %s1035_s22, 256, %s1037_s28, %s1045_s6, %s888_s14, %s888_s14, %s889_s21  }
  0x4f   : > { %p1224_p3 = scmp.ne.s32.totalorder %s1218_s27, 0 }
  0x50   : > { %s1079_s12 = sand.u32 (!%p1224_p3), 1, %s869_s16   ;;  %p1225_p7 = scmp.ne.s32.totalorder (!%p1224_p3), %s1216_s25, 0 }
  0x51   : > { %222 = sbr.rel (%p1224_p3) target bundleno = 750 (0x2ee), region = 32  ;;  %s1082_s7 = sshll.u32 (!%p1224_p3), %s1079_s12, 4 }
  0x52   : > { %s225_s8 = scalar_lea.sflag (!%p1224_p3), [#allocation3], %s1079_s12  ;;  %s228_s24 = scalar_lea.vmem (!%p1224_p3), [#allocation2], %s1082_s7 }
  0x58   : > { %848 = dma.done.wait (%p1225_p7), %s225_s8, 256  }
  0x59   : > { %850 = vsyncadd (%p1225_p7), %s225_s8, 4294967040  ;;  %p1226_p13 = scmp.ne.s32.totalorder %s1214_s23, 0 }
  0x5b   : > { %852 = dma.done.wait (%p1226_p13), [#allocation6], 512  }
  0x5c   : > { %854 = vsyncadd (%p1226_p13), [#allocation6], 4294966784  ;;  %vm267_vm0 = vcmask 261120   ;;  %v265_v0 = vld [vmem:[%s228_s24] sm:$0xff]  ;;  %v266_v1 = vld [vmem:[%s228_s24 + $0x8] sm:$0xff]  ;;  %s254_s23 = scalar_lea.vmem [#allocation7], %s1082_s7 }
  0x5d   : > { %v268_v2 = vsel %vm267_vm0, %v265_v0, 0.0  ;;  %v271_v3 = vsel %vm267_vm0, %v266_v1, 0.0  ;;  %v295_v14 = vld [vmem:[#allocation5] sm:$0xff]  ;;  %v296_v15 = vld [vmem:[#allocation5 + $0x8] sm:$0xff]  ;;  %v297_v16 = vld [vmem:[#allocation5 + $0x10] sm:$0xff]  ;;  %s420_s25 = sshll.u32 %s254_s23, 4  ;;  %s1105_s25 = int_to_ptr.vmem [resolvable:$true] %s420_s25 }
  0x5e   : > { %269 = vadd.xlane.f32.xlu0 %v268_v2  ;;  %v614_v17 = vpack.c.bf16 %v296_v15, %v295_v14  ;;  %v298_v18 = vld [vmem:[#allocation5 + $0x18] sm:$0xff]  ;;  %v583_v30 = vld [vmem:[%s1207_s2] ss:$0 sm:$0xff]  ;;  %s595_s21 = sshll.u32 %s877_s18, 8  ;;  %s891_s29 = smov 96  }
  0x5f   : > { %v618_v19 = vpack.c.bf16 %v298_v18, %v297_v16  ;;  %s1112_s6 = scalar_lea.hbm %s1208_s3, %s595_s21  ;;  %s400_s9 = scalar_lea.sflag [#allocation4], %s1079_s12 }
  0x60   : > { %615 = vmatprep.subr.bf16.mxu0 %v614_v17  ;;  %s767_s11 = scalar_lea.vmem %s1105_s25, 256  ;;  %s892_s13 = smov [#allocation7]  }
  0x61   : > { %617 = vmatpush3.bf16.msra.mxu0 %v614_v17  ;;  %p768_p4 = scmp.ne.s32.totalorder %s1105_s25, %s767_s11  ;;  %s771_s8 = sshll.u32 %s892_s13, 4  ;;  %s772_s8 = int_to_ptr.vmem [resolvable:$false] %s771_s8 }
  0x62   : > { %272 = vadd.xlane.f32.xlu0 %v271_v3  ;;  %619 = vmatprep.subr.bf16.mxu0 %v618_v19  ;;  %s773_s24 = scalar_lea.vmem %s772_s8, 512  ;;  %p774_p12 = scmp.lt.s32.totalorder %s1105_s25, %s772_s8 }
  0x63   : > { %p769_p6 = pnand %p768_p4, %p1020_p10  ;;  %p775_p11 = scmp.lt.s32.totalorder %s773_s24, %s767_s11 }
  0x65   : > { %621 = vmatpush3.bf16.msra.mxu0 %v618_v19  ;;  %p770_p8 = pneg %p769_p6  ;;  %p776_p0 = por %p775_p11, %p774_p12 }
  0x67   : > { %p777_p5 = pnand %p776_p0, %p770_p8 }
  0xeb   : > { %v270_v4 = vpop.xlane.xlu0 %269 }
  0xec   : > { %v275_v5 = vmul.f32 0.03125, %v270_v4 }
  0xee   : > { %v277_v6 = vsub.f32 %v265_v0, %v275_v5 }
  0xef   : > { %v273_v7 = vpop.xlane.xlu0 %272 }
  0xf0   : > { %v276_v8 = vmul.f32 0.03125, %v273_v7  ;;  %v279_v9 = vmul.f32 %v277_v6, %v277_v6 }
  0xf2   : > { %v278_v10 = vsub.f32 %v266_v1, %v276_v8  ;;  %v281_v11 = vsel %vm267_vm0, %v279_v9, 0.0 }
  0xf3   : > { %282 = vadd.xlane.f32.xlu1 %v281_v11 }
  0xf4   : > { %v280_v12 = vmul.f32 %v278_v10, %v278_v10 }
  0xf6   : > { %v284_v13 = vsel %vm267_vm0, %v280_v12, 0.0 }
  0xf7   : > { %285 = vadd.xlane.f32.xlu1 %v284_v13 }
 0x180   : > { %v283_v20 = vpop.xlane.xlu1 %282 }
 0x181   : > { %v287_v21 = vmul.f32 0.03125, %v283_v20 }
 0x183   : > { %v289_v22 = vadd.f32 1e-05, %v287_v21 }
 0x184   : > { %v286_v23 = vpop.xlane.xlu1 %285 }
 0x185   : > { %705 = vrsqrt.f32 %v289_v22  ;;  %v288_v24 = vmul.f32 0.03125, %v286_v23 }
 0x187   : > { %v290_v25 = vadd.f32 1e-05, %v288_v24 }
 0x189   : > { %707 = vrsqrt.f32 %v290_v25 }
 0x18f   : > { %v706_v26 = vpop.eup %705 }
 0x190   : > { %v293_v27 = vmul.f32 %v706_v26, %v277_v6 }
 0x192   : > { %611 = vmatprep.mubr.msk.f32.mxu0 %vm267_vm0, %v293_v27 }
 0x193   : > { %v708_v28 = vpop.eup %707 }
 0x194   : > { %v294_v29 = vmul.f32 %v708_v28, %v278_v10 }
 0x196   : > { %612 = vmatmul.mubr.msk.f32.vlgmr.msra.gmra.mrb[0].mxu0 %vm267_vm0, %v294_v29 }
 0x269   : > { %v613_v31 = vpop.f32.mrb[0].mxu0 }
 0x26a   : > { %v384_v32 = vadd.f32 %v613_v31, %v583_v30  ;;  %v378_v33 = vpop.f32.mrb[1].mxu0 }
 0x26b   : > { %v379_v34 = vadd.f32 %v583_v30, %v378_v33 }
 0x26c   : > { %388 = vst.msk [vmem:[%s254_s23 + $0x8] sm:$0xff] %vm267_vm0, %v384_v32  ;;  %393 = vrot.lane.b32.xlu1 %v384_v32, %s891_s29 }
 0x26d   : > { %387 = vst.msk [vmem:[%s254_s23] sm:$0xff] %vm267_vm0, %v379_v34  ;;  %391 = vrot.lane.b32.xlu0 %v379_v34, %s891_s29 }
 0x26e   : > { %780 = shalt.err (!%p777_p5)
}
 0x26f   : > { %s781_s23 = scalar_lea.hbm %s1112_s6, 256  ;;  %s785_s22 = scalar_lea.hbm %s1208_s3, 512 }
 0x270   : > { %p782_p9 = scmp.ne.s32.totalorder %s1112_s6, %s781_s23  ;;  %p786_p3 = scmp.lt.u32.totalorder %s1112_s6, %s1208_s3 }
 0x271   : > { %p787_p7 = scmp.lt.u32.totalorder %s785_s22, %s781_s23  ;;  %p789_p4 = scmp.lt.u32.totalorder %s781_s23, %s1112_s6 }
 0x272   : > { %p783_p1 = pnand %p782_p9, %p1020_p10 }
 0x273   : > { %p788_p13 = por %p787_p7, %p786_p3 }
 0x274   : > { %p784_p2 = pneg %p783_p1 }
 0x275   : > { %p790_p6 = por %p789_p4, %p788_p13 }
 0x277   : > { %p791_p8 = pnand %p790_p6, %p784_p2 }
 0x279   : > { %794 = shalt.err (!%p791_p8)
}
 0x27a   : > { %s893_s11 = smov 128   ;;  %s894_s13 = smov 8  }
 0x27b   : > { %628 = dma.vmem_to_hbm [thread:$0]  (%p1020_p10), %s1105_s25, 256, %s1112_s6, %s400_s9, %s893_s11, %s893_s11, %s894_s13  }
 0x27c   : > { %s261_s8 = scalar_lea.vmem [#allocation8], %s1082_s7  ;;  %s1151_s14 = scalar_lea.hbm %s1209_s4, %s595_s21 }
 0x27d   : > { %s438_s24 = sshll.u32 %s261_s8, 4  ;;  %s405_s25 = scalar_lea.sflag [#allocation9], %s1079_s12  ;;  %s1144_s24 = int_to_ptr.vmem [resolvable:$true] %s438_s24 }
 0x27e   : > { %s795_s7 = scalar_lea.vmem %s1144_s24, 256  ;;  %s895_s6 = smov [#allocation8]  }
 0x27f   : > { %p796_p12 = scmp.ne.s32.totalorder %s1144_s24, %s795_s7  ;;  %s799_s9 = sshll.u32 %s895_s6, 4  ;;  %s800_s9 = int_to_ptr.vmem [resolvable:$false] %s799_s9 }
 0x280   : > { %s801_s18 = scalar_lea.vmem %s800_s9, 512  ;;  %p802_p5 = scmp.lt.s32.totalorder %s1144_s24, %s800_s9 }
 0x281   : > { %p797_p11 = pnand %p796_p12, %p1020_p10  ;;  %p803_p9 = scmp.lt.s32.totalorder %s801_s18, %s795_s7 }
 0x283   : > { %p798_p0 = pneg %p797_p11  ;;  %p804_p1 = por %p803_p9, %p802_p5 }
 0x285   : > { %p805_p2 = pnand %p804_p1, %p798_p0 }
 0x2de   : > { %v394_v35 = vpop.permute.xlu1 %393 }
 0x2df   : > { %398 = vst.msk [vmem:[%s261_s8 + $0x8] sm:$0xff] %vm267_vm0, %v394_v35  ;;  %v392_v36 = vpop.permute.xlu0 %391 }
 0x2e0   : > { %397 = vst.msk [vmem:[%s261_s8] sm:$0xff] %vm267_vm0, %v392_v36 }
 0x2e1   : > { %808 = shalt.err (!%p805_p2)
}
 0x2e2   : > { %s809_s21 = scalar_lea.hbm %s1151_s14, 256  ;;  %s813_s29 = scalar_lea.hbm %s1209_s4, 512 }
 0x2e3   : > { %p810_p3 = scmp.ne.s32.totalorder %s1151_s14, %s809_s21  ;;  %p814_p4 = scmp.lt.u32.totalorder %s1151_s14, %s1209_s4 }
 0x2e4   : > { %p815_p6 = scmp.lt.u32.totalorder %s813_s29, %s809_s21  ;;  %p817_p12 = scmp.lt.u32.totalorder %s809_s21, %s1151_s14 }
 0x2e5   : > { %p811_p7 = pnand %p810_p3, %p1020_p10 }
 0x2e6   : > { %p816_p8 = por %p815_p6, %p814_p4 }
 0x2e7   : > { %p812_p13 = pneg %p811_p7 }
 0x2e8   : > { %p818_p11 = por %p817_p12, %p816_p8 }
 0x2ea   : > { %p819_p0 = pnand %p818_p11, %p812_p13 }
 0x2ec   : > { %822 = shalt.err (!%p819_p0)
}
 0x2ed   : > { %629 = dma.vmem_to_hbm [thread:$0]  (%p1020_p10), %s1144_s24, 256, %s1151_s14, %s405_s25, %s893_s11, %s893_s11, %s894_s13  }
 0x2ee PF: > { %s453_s27 = sand.u32 1, %s865_s15   ;;  %p1227_p5 = scmp.ne.s32.totalorder %s1217_s26, 0 }
 0x2ef   : > { %p1228_p9 = scmp.ge.s32.totalorder %s885_s20, 2  ;;  %s454_s7 = scalar_lea.sflag [#allocation4], %s453_s27 }
 0x2f1   : > { %p641_p1 = pnand %p1228_p9, %p1227_p5 }
 0x2f3   : > { %856 = dma.done.wait (!%p641_p1), %s454_s7, 256  }
 0x2f4   : > { %858 = vsyncadd (!%p641_p1), %s454_s7, 4294967040  ;;  %s463_s30 = scalar_lea.sflag [#allocation9], %s453_s27 }
 0x2f5   : > { %860 = dma.done.wait (!%p641_p1), %s463_s30, 256  }
 0x2f6   : > { %862 = vsyncadd (!%p641_p1), %s463_s30, 4294967040  ;;  %s25_s20 = sadd.s32 1, %s885_s20   ;;  %s1229_s15 = smov %s869_s16 }
 0x2f7   : > { %p22_p2 = scmp.ge.s32.totalorder %s25_s20, 4   ;;  %s1230_s16 = smov %s873_s17 }
 0x2f8   : > { %s1231_s17 = smov %s1029_s10  ;;  %s1232_s18 = smov %s881_s19 }
 0x2f9   : > { %s1233_s19 = smov %s1235_s5  ;;  %24 = sbr.rel (!%p22_p2) target bundleno = 9 (0x9), region = 98 }
 0x300   :  { %468 = vsyncpa [#allocation3], 1 }
 0x301   :  { %470 = vsyncpa [#allocation3 + $0x1], 1 }
 0x302   :  { %471 = vsyncpa [#allocation6], 1 }
 0x303   :  { %472 = vsyncpa [#allocation4], 1 }
 0x304   :  { %474 = vsyncpa [#allocation4 + $0x1], 1 }
 0x305   :  { %475 = vsyncpa [#allocation9], 1 }
 0x306   :  { %477 = vsyncpa [#allocation9 + $0x1], 1 }

</bundles_post_ra>
